<compile_context>
chip_gen: v7x
topology: tpu7x:2x2x1
jax: 0.10.0
libtpu: 0.0.40
codegen_flags: <defaults>
</compile_context>

<pallas_src>
import functools

import jax
import jax.numpy as jnp
from jax import lax
from jax.experimental import pallas as pl
from jax.experimental.pallas import tpu as pltpu

IMAGENET_MEAN = (0.485, 0.456, 0.406)
IMAGENET_STD = (0.229, 0.224, 0.225)
SCALE = 255.0
FEATURES = 2048
# Explicit scoped-VMEM budget: all kernels below stay well under 16 MiB, so
# 32 MiB is safe on v5e (128 MiB phys), v6e (128 MiB) and v7x (64 MiB).
VMEM_LIMIT_BYTES = 32 * 1024 * 1024


def _round_up(x, m):
    return ((x + m - 1) // m) * m


# ----------------------------------------------------------------------------
# Kernel 1: fused  (x*std+mean) -> *255 -> floor/clip(uint8) -> /255 -> matmul
# ----------------------------------------------------------------------------
def _feature_kernel(x_ref, mean_ref, std_ref, w_ref, o_ref, acc_ref):
    @pl.when(pl.program_id(2) == 0)
    def _():
        acc_ref[...] = jnp.zeros_like(acc_ref)

    # inverse ImageNet normalization -> [0,1]; *255 + trunc + clip == uint8 cast
    y = x_ref[...] * std_ref[...] + mean_ref[...]
    q = jnp.clip(jnp.floor(y * SCALE), 0.0, 255.0)
    lhs = (q * (1.0 / SCALE)).astype(jnp.bfloat16)        # extractor input
    acc_ref[...] += jnp.dot(lhs, w_ref[...], preferred_element_type=jnp.float32)

    @pl.when(pl.program_id(2) == pl.num_programs(2) - 1)
    def _():
        o_ref[...] = acc_ref[...]


def unnorm_quantize_project(x_flat, mean_row, std_row, w_bf16, *, tn=512, tk=512):
    m, k = x_flat.shape
    kw, n = w_bf16.shape
    assert k == kw and n % tn == 0
    tm = min(_round_up(m, 8), 256)          # batch padded to sublane multiple
    mp = _round_up(m, tm)
    kp = _round_up(k, tk)                   # K padding: zero image cols x zero w rows
    x_p = jnp.pad(x_flat.astype(jnp.float32), ((0, mp - m), (0, kp - k)))
    mean_p = jnp.pad(mean_row.astype(jnp.float32), ((0, 0), (0, kp - k)))
    std_p = jnp.pad(std_row.astype(jnp.float32), ((0, 0), (0, kp - k)))
    w_p = jnp.pad(w_bf16, ((0, kp - k), (0, 0)))
    out = pl.pallas_call(
        _feature_kernel,
        out_shape=jax.ShapeDtypeStruct((mp, n), jnp.float32),
        grid_spec=pltpu.PrefetchScalarGridSpec(
            num_scalar_prefetch=0,
            grid=(mp // tm, n // tn, kp // tk),
            in_specs=[pl.BlockSpec((tm, tk), lambda i, j, kk: (i, kk)),
                      pl.BlockSpec((1, tk), lambda i, j, kk: (0, kk)),
                      pl.BlockSpec((1, tk), lambda i, j, kk: (0, kk)),
                      pl.BlockSpec((tk, tn), lambda i, j, kk: (kk, j))],
            out_specs=pl.BlockSpec((tm, tn), lambda i, j, kk: (i, j)),
            scratch_shapes=[pltpu.VMEM((tm, tn), jnp.float32)]),
        compiler_params=pltpu.CompilerParams(
            dimension_semantics=("parallel", "parallel", "arbitrary"),
            vmem_limit_bytes=VMEM_LIMIT_BYTES),
    )(x_p, mean_p, std_p, w_p)
    return out[:m]


# ----------------------------------------------------------------------------
# Kernel 2: general tiled matmul (f32, output stored once on last k step)
# ----------------------------------------------------------------------------
def _matmul_kernel(a_ref, b_ref, o_ref, acc_ref):
    @pl.when(pl.program_id(2) == 0)
    def _():
        acc_ref[...] = jnp.zeros_like(acc_ref)

    acc_ref[...] += jnp.dot(a_ref[...], b_ref[...],
                            preferred_element_type=jnp.float32)

    @pl.when(pl.program_id(2) == pl.num_programs(2) - 1)
    def _():
        o_ref[...] = acc_ref[...].astype(o_ref.dtype)


def matmul(a, b, *, tm=512, tn=512, tk=512):
    m, k = a.shape
    k2, n = b.shape
    assert k == k2
    tm, tn, tk = min(tm, m), min(tn, n), min(tk, k)
    assert m % tm == 0 and n % tn == 0 and k % tk == 0
    return pl.pallas_call(
        _matmul_kernel,
        out_shape=jax.ShapeDtypeStruct((m, n), jnp.float32),
        grid_spec=pltpu.PrefetchScalarGridSpec(
            num_scalar_prefetch=0,
            grid=(m // tm, n // tn, k // tk),
            in_specs=[pl.BlockSpec((tm, tk), lambda i, j, kk: (i, kk)),
                      pl.BlockSpec((tk, tn), lambda i, j, kk: (kk, j))],
            out_specs=pl.BlockSpec((tm, tn), lambda i, j, kk: (i, j)),
            scratch_shapes=[pltpu.VMEM((tm, tn), jnp.float32)]),
        compiler_params=pltpu.CompilerParams(
            dimension_semantics=("parallel", "parallel", "arbitrary"),
            vmem_limit_bytes=VMEM_LIMIT_BYTES),
    )(a.astype(jnp.float32), b.astype(jnp.float32))


# ----------------------------------------------------------------------------
# Kernel 3: (A * scale_row) @ B^T  without materializing B^T or the scaled A
# ----------------------------------------------------------------------------
def _matmul_scaled_nt_kernel(a_ref, s_ref, b_ref, o_ref, acc_ref):
    @pl.when(pl.program_id(2) == 0)
    def _():
        acc_ref[...] = jnp.zeros_like(acc_ref)

    a = a_ref[...] * s_ref[...]                               # (tm, tk) * (1, tk)
    acc_ref[...] += lax.dot_general(a, b_ref[...], (((1,), (1,)), ((), ())),
                                    preferred_element_type=jnp.float32)

    @pl.when(pl.program_id(2) == pl.num_programs(2) - 1)
    def _():
        o_ref[...] = acc_ref[...].astype(o_ref.dtype)


def matmul_scaled_nt(a, scale_row, b, *, tm=512, tn=512, tk=512):
    m, k = a.shape
    n, k2 = b.shape
    assert k == k2 and scale_row.shape == (1, k)
    tm, tn, tk = min(tm, m), min(tn, n), min(tk, k)
    assert m % tm == 0 and n % tn == 0 and k % tk == 0
    return pl.pallas_call(
        _matmul_scaled_nt_kernel,
        out_shape=jax.ShapeDtypeStruct((m, n), jnp.float32),
        grid_spec=pltpu.PrefetchScalarGridSpec(
            num_scalar_prefetch=0,
            grid=(m // tm, n // tn, k // tk),
            in_specs=[pl.BlockSpec((tm, tk), lambda i, j, kk: (i, kk)),
                      pl.BlockSpec((1, tk), lambda i, j, kk: (0, kk)),
                      pl.BlockSpec((tn, tk), lambda i, j, kk: (j, kk))],
            out_specs=pl.BlockSpec((tm, tn), lambda i, j, kk: (i, j)),
            scratch_shapes=[pltpu.VMEM((tm, tn), jnp.float32)]),
        compiler_params=pltpu.CompilerParams(
            dimension_semantics=("parallel", "parallel", "arbitrary"),
            vmem_limit_bytes=VMEM_LIMIT_BYTES),
    )(a.astype(jnp.float32), scale_row.astype(jnp.float32), b.astype(jnp.float32))


# ----------------------------------------------------------------------------
# Kernel 4: covariance  S = (F - mu)^T (F - mu) / (n - 1)
#   sample axis tiled as the reduction grid axis; centering fused per-tile
#   (mu computed once outside -> no redundant mean reductions per output tile).
# ----------------------------------------------------------------------------
def _cov_kernel(fi_ref, fj_ref, mi_ref, mj_ref, o_ref, acc_ref, *, inv_nm1):
    @pl.when(pl.program_id(2) == 0)
    def _():
        acc_ref[...] = jnp.zeros_like(acc_ref)

    ci = fi_ref[...] - mi_ref[...]
    cj = fj_ref[...] - mj_ref[...]
    acc_ref[...] += lax.dot_general(ci, cj, (((0,), (0,)), ((), ())),
                                    preferred_element_type=jnp.float32)

    @pl.when(pl.program_id(2) == pl.num_programs(2) - 1)
    def _():
        o_ref[...] = acc_ref[...] * inv_nm1


def covariance(feats, mu, *, td=512, tb=256):
    n, d = feats.shape
    assert d % td == 0
    mu_row = mu.reshape(1, d).astype(jnp.float32)
    if n <= tb:
        tbb = _round_up(n, 8)
        n_pad = tbb
    else:
        tbb = tb
        n_pad = _round_up(n, tb)
    f = feats.astype(jnp.float32)
    if n_pad > n:
        # pad with mu rows: centered padding rows are exactly zero -> no bias
        f = jnp.concatenate([f, jnp.broadcast_to(mu_row, (n_pad - n, d))], axis=0)
    kern = functools.partial(_cov_kernel, inv_nm1=1.0 / float(max(n - 1, 1)))
    return pl.pallas_call(
        kern,
        out_shape=jax.ShapeDtypeStruct((d, d), jnp.float32),
        grid_spec=pltpu.PrefetchScalarGridSpec(
            num_scalar_prefetch=0,
            grid=(d // td, d // td, n_pad // tbb),
            in_specs=[pl.BlockSpec((tbb, td), lambda i, j, kk: (kk, i)),
                      pl.BlockSpec((tbb, td), lambda i, j, kk: (kk, j)),
                      pl.BlockSpec((1, td), lambda i, j, kk: (0, i)),
                      pl.BlockSpec((1, td), lambda i, j, kk: (0, j))],
            out_specs=pl.BlockSpec((td, td), lambda i, j, kk: (i, j)),
            scratch_shapes=[pltpu.VMEM((td, td), jnp.float32)]),
        compiler_params=pltpu.CompilerParams(
            dimension_semantics=("parallel", "parallel", "arbitrary"),
            vmem_limit_bytes=VMEM_LIMIT_BYTES),
    )(f, f, mu_row, mu_row)


# ----------------------------------------------------------------------------
# Frechet distance from statistics
# ----------------------------------------------------------------------------
def frechet_distance(mu1, s1, mu2, s2):
    diff = mu1 - mu2
    a = jnp.sum(diff * diff)
    b = jnp.trace(s1) + jnp.trace(s2)
    # tr(sqrtm(s1 @ s2)) via the symmetric form sqrtm(s1^1/2 s2 s1^1/2)
    # TODO(synk): eigendecomposition (matrix sqrt) has no Pallas equivalent;
    # done with jnp.linalg, all 2048x2048 matmuls around it are Pallas.
    ev1, v1 = jnp.linalg.eigh(s1)
    sqrt_ev1 = jnp.sqrt(jnp.clip(ev1, 0.0, None))
    s1_sqrt = matmul_scaled_nt(v1, sqrt_ev1.reshape(1, -1), v1)   # (V*sqrt_e) @ V^T
    inner = matmul(matmul(s1_sqrt, s2), s1_sqrt)
    ev = jnp.linalg.eigvalsh(inner)
    c = jnp.sum(jnp.sqrt(jnp.clip(ev, 0.0, None)))
    return a + b - 2.0 * c


# ----------------------------------------------------------------------------
# FID module (single-batch update + compute, as in FID.forward)
# ----------------------------------------------------------------------------
class FIDPallas:
    features = FEATURES

    def __init__(self, key, image_shape):
        n, c, h, w = image_shape
        assert c == len(IMAGENET_MEAN)
        hw = h * w
        # per-flattened-column inverse-normalization constants (lane-dense rows)
        self.mean_row = jnp.repeat(jnp.asarray(IMAGENET_MEAN, jnp.float32),
                                   hw).reshape(1, c * hw)
        self.std_row = jnp.repeat(jnp.asarray(IMAGENET_STD, jnp.float32),
                                  hw).reshape(1, c * hw)
        # TODO(synk): stands in for pretrained InceptionV3 (feature=2048); stored
        # bf16 so the dominant HBM stream is halved (f32 MXU accumulation).
        self.w_feat = (jax.random.normal(key, (c * hw, self.features), jnp.float32)
                       * 0.02).astype(jnp.bfloat16)

    def __call__(self, preds, target):
        nf, nr = preds.shape[0], target.shape[0]
        # one fused pass over both image sets: w_feat read from HBM exactly once,
        # unnormalize/quantize done on-the-fly inside the matmul kernel.
        x = jnp.concatenate([preds.reshape(nf, -1), target.reshape(nr, -1)], axis=0)
        feats = unnorm_quantize_project(x, self.mean_row, self.std_row, self.w_feat)
        f_fake, f_real = feats[:nf], feats[nf:]
        mu_fake = jnp.mean(f_fake, axis=0)
        mu_real = jnp.mean(f_real, axis=0)
        s_fake = covariance(f_fake, mu_fake)
        s_real = covariance(f_real, mu_real)
        # torchmetrics order: FID(real stats, fake stats)
        return frechet_distance(mu_real, s_real, mu_fake, s_fake)


if __name__ == "__main__":
    key = jax.random.PRNGKey(0)
    k1, k2, k3 = jax.random.split(key, 3)
    N, C, H, W = 2, 3, 16, 16
    preds = jax.random.normal(k1, (N, C, H, W), jnp.float32)
    target = jax.random.normal(k2, (N, C, H, W), jnp.float32)

    model = FIDPallas(k3, (N, C, H, W))
    out = model(preds, target)
    jax.block_until_ready(out)
    assert out.shape == () and bool(jnp.isfinite(out))
    print("KERNEL_OK")
</pallas_src>

<mosaic_0001>
module attributes {stable_mosaic.version = 11 : i64} {
  func.func @_feature_kernel(%arg0: i32, %arg1: i32, %arg2: i32, %arg3: memref<8x512xf32, #tpu.memory_space<vmem>>, %arg4: memref<1x512xf32, #tpu.memory_space<vmem>>, %arg5: memref<1x512xf32, #tpu.memory_space<vmem>>, %arg6: memref<512x512xbf16, #tpu.memory_space<vmem>>, %arg7: memref<8x512xf32, #tpu.memory_space<vmem>>, %arg8: memref<8x512xf32, #tpu.memory_space<vmem>>) attributes {dimension_semantics = [#tpu.dimension_semantics<parallel>, #tpu.dimension_semantics<parallel>, #tpu.dimension_semantics<arbitrary>], iteration_bounds = array<i64: 1, 4, 2>, scalar_prefetch = 0 : i64, scratch_operands = 1 : i64, tpu.core_type = #tpu.core_type<tc>, window_params = [{transform_indices = @transform_0, window_bounds = array<i64: 8, 512>}, {transform_indices = @transform_1, window_bounds = array<i64: 1, 512>}, {transform_indices = @transform_2, window_bounds = array<i64: 1, 512>}, {transform_indices = @transform_3, window_bounds = array<i64: 512, 512>}, {transform_indices = @transform_4, window_bounds = array<i64: 8, 512>}]} {
    %c0_i32 = arith.constant 0 : i32
    %0 = arith.cmpi eq, %arg2, %c0_i32 : i32
    %1 = arith.extui %0 : i1 to i32
    %c0_i32_0 = arith.constant 0 : i32
    %2 = arith.cmpi ne, %1, %c0_i32_0 : i32
    scf.if %2 {
      %cst_17 = arith.constant 0.000000e+00 : f32
      %28 = vector.broadcast %cst_17 : f32 to vector<8x512xf32>
      %c0_18 = arith.constant 0 : index
      %c0_19 = arith.constant 0 : index
      %29 = vector.load %arg8[%c0_18, %c0_19] : memref<8x512xf32, #tpu.memory_space<vmem>>, vector<8x512xf32>
      tpu.vector_store %arg8[%c0_18, %c0_19], %28 {strides = array<i32>} : memref<8x512xf32, #tpu.memory_space<vmem>>, vector<8x512xf32>,
    } else {
    }
    %c0 = arith.constant 0 : index
    %c0_1 = arith.constant 0 : index
    %3 = vector.load %arg3[%c0, %c0_1] : memref<8x512xf32, #tpu.memory_space<vmem>>, vector<8x512xf32>
    %c0_2 = arith.constant 0 : index
    %c0_3 = arith.constant 0 : index
    %4 = vector.load %arg5[%c0_2, %c0_3] : memref<1x512xf32, #tpu.memory_space<vmem>>, vector<1x512xf32>
    %5 = vector.broadcast %4 : vector<1x512xf32> to vector<8x512xf32>
    %6 = arith.mulf %3, %5 : vector<8x512xf32>
    %c0_4 = arith.constant 0 : index
    %c0_5 = arith.constant 0 : index
    %7 = vector.load %arg4[%c0_4, %c0_5] : memref<1x512xf32, #tpu.memory_space<vmem>>, vector<1x512xf32>
    %8 = vector.broadcast %7 : vector<1x512xf32> to vector<8x512xf32>
    %9 = arith.addf %6, %8 : vector<8x512xf32>
    %cst = arith.constant 2.550000e+02 : f32
    %10 = vector.broadcast %cst : f32 to vector<8x512xf32>
    %11 = arith.mulf %9, %10 : vector<8x512xf32>
    %12 = math.floor %11 : vector<8x512xf32>
    %cst_6 = arith.constant 0.000000e+00 : f32
    %cst_7 = arith.constant 2.550000e+02 : f32
    %13 = vector.broadcast %cst_6 : f32 to vector<8x512xf32>
    %14 = arith.maximumf %13, %12 : vector<8x512xf32>
    %15 = vector.broadcast %cst_7 : f32 to vector<8x512xf32>
    %16 = arith.minimumf %15, %14 : vector<8x512xf32>
    %cst_8 = arith.constant 0.00392156886 : f32
    %17 = vector.broadcast %cst_8 : f32 to vector<8x512xf32>
    %18 = arith.mulf %16, %17 : vector<8x512xf32>
    %19 = arith.truncf %18 : vector<8x512xf32> to vector<8x512xbf16>
    %c0_9 = arith.constant 0 : index
    %c0_10 = arith.constant 0 : index
    %20 = vector.load %arg8[%c0_9, %c0_10] : memref<8x512xf32, #tpu.memory_space<vmem>>, vector<8x512xf32>
    %c0_11 = arith.constant 0 : index
    %c0_12 = arith.constant 0 : index
    %21 = vector.load %arg6[%c0_11, %c0_12] : memref<512x512xbf16, #tpu.memory_space<vmem>>, vector<512x512xbf16>
    %cst_13 = arith.constant dense<0.000000e+00> : vector<8x512xf32>
    %22 = tpu.matmul %19, %21, %cst_13 {dimension_numbers = #tpu.dot_dimension_numbers<[1], [0], [0], [1], [0, 0, 1, 1], [], []>} : vector<8x512xbf16>, vector<512x512xbf16>, vector<8x512xf32> -> vector<8x512xf32>
    %23 = arith.addf %20, %22 : vector<8x512xf32>
    %c0_14 = arith.constant 0 : index
    %c0_15 = arith.constant 0 : index
    %24 = vector.load %arg8[%c0_14, %c0_15] : memref<8x512xf32, #tpu.memory_space<vmem>>, vector<8x512xf32>
    tpu.vector_store %arg8[%c0_14, %c0_15], %23 {strides = array<i32>} : memref<8x512xf32, #tpu.memory_space<vmem>>, vector<8x512xf32>,
    %c1_i32 = arith.constant 1 : i32
    %25 = arith.cmpi eq, %arg2, %c1_i32 : i32
    %26 = arith.extui %25 : i1 to i32
    %c0_i32_16 = arith.constant 0 : i32
    %27 = arith.cmpi ne, %26, %c0_i32_16 : i32
    scf.if %27 {
      %c0_17 = arith.constant 0 : index
      %c0_18 = arith.constant 0 : index
      %28 = vector.load %arg8[%c0_17, %c0_18] : memref<8x512xf32, #tpu.memory_space<vmem>>, vector<8x512xf32>
      %c0_19 = arith.constant 0 : index
      %c0_20 = arith.constant 0 : index
      %29 = vector.load %arg7[%c0_19, %c0_20] : memref<8x512xf32, #tpu.memory_space<vmem>>, vector<8x512xf32>
      tpu.vector_store %arg7[%c0_19, %c0_20], %28 {strides = array<i32>} : memref<8x512xf32, #tpu.memory_space<vmem>>, vector<8x512xf32>,
    } else {
    }
    return
  }
  func.func @transform_0(%arg0: i32, %arg1: i32, %arg2: i32) -> (i32, i32) {
    %c0_i32 = arith.constant 0 : i32
    return %arg0, %arg2 : i32, i32
  }
  func.func @transform_1(%arg0: i32, %arg1: i32, %arg2: i32) -> (i32, i32) {
    %c0_i32 = arith.constant 0 : i32
    %c0_i32_0 = arith.constant 0 : i32
    return %c0_i32, %arg2 : i32, i32
  }
  func.func @transform_2(%arg0: i32, %arg1: i32, %arg2: i32) -> (i32, i32) {
    %c0_i32 = arith.constant 0 : i32
    %c0_i32_0 = arith.constant 0 : i32
    return %c0_i32, %arg2 : i32, i32
  }
  func.func @transform_3(%arg0: i32, %arg1: i32, %arg2: i32) -> (i32, i32) {
    %c0_i32 = arith.constant 0 : i32
    return %arg2, %arg1 : i32, i32
  }
  func.func @transform_4(%arg0: i32, %arg1: i32, %arg2: i32) -> (i32, i32) {
    %c0_i32 = arith.constant 0 : i32
    return %arg0, %arg1 : i32, i32
  }
}

</mosaic_0001>

<bundles_post_ra>
// kernel: tpu_custom_call.1
= control target key start
LH: loop header
LB: loop body
LE: loop exit
PB: predicated region body
PF: predicated region fallthrough
CT: control target
= control target key end

     0   :  { %s2971_s0 = inlined_call_operand.hbm [shape: f32[8,1024], index: 0, kind: input, shape index: {}]   ;;  %s2972_s1 = inlined_call_operand.hbm [shape: f32[1,1024], index: 1, kind: input, shape index: {}]   ;;  %s2973_s2 = inlined_call_operand.hbm [shape: f32[1,1024], index: 2, kind: input, shape index: {}]   ;;  %s2974_s3 = inlined_call_operand.hbm [shape: bf16[1024,2048], index: 3, kind: input, shape index: {}]   ;;  %s2975_s4 = inlined_call_operand.hbm [shape: f32[8,2048], index: 4, kind: output, shape index: {}]  }
   0x1   :  { %2999 = sst [smem:[#allocation29_spill]] %s2972_s1 }
   0x2   :  { %3000 = sst [smem:[#allocation30_spill]] %s2975_s4 }
   0x3   :  { %9 = vsyncpa [#allocation4], 0 }
   0x4   :  { %11 = vsyncpa [#allocation4 + $0x1], 0 }
   0x5   :  { %12 = vsyncpa [#allocation7], 0 }
   0x6   :  { %14 = vsyncpa [#allocation7 + $0x1], 0 }
   0x7   :  { %15 = vsyncpa [#allocation10], 0 }
   0x8   :  { %17 = vsyncpa [#allocation10 + $0x1], 0 }
   0x9   :  { %18 = vsyncpa [#allocation5], 0 }
   0xa   :  { %20 = vsyncpa [#allocation5 + $0x1], 0  ;;  %s2394_s15 = smov 0   ;;  %s2396_s16 = smov 0  }
   0xb   :  { %s2398_s17 = smov 0   ;;  %s2400_s18 = smov 0  }
   0xc   :  { %s2402_s19 = smov 0   ;;  %s2404_s20 = smov 0  }
   0xd   :  { %s2406_s21 = smov 0   ;;  %s2408_s22 = smov 0  }
   0xe   :  { %s2410_s23 = smov 0   ;;  %s2412_s24 = smov 0  }
   0xf   :  { %s2414_s25 = smov 0   ;;  %s2416_s26 = smov 0  }
  0x10   :  { %s2418_s27 = smov 0   ;;  %s2420_s28 = smov 0  }
  0x11 LB: > { %3001 = sst [smem:[#allocation16_spill]] %s2306_s15  ;;  %s2463_s29 = sadd.s32 4294967295, %s2358_s28   ;;  %s2358_s28 = sphi %s2420_s28, %s26_s28   ;;  %s2354_s27 = sphi %s2418_s27, %s3068_s27   ;;  %s2350_s26 = sphi %s2416_s26, %s3067_s26   ;;  %s2346_s25 = sphi %s2414_s25, %s3066_s25   ;;  %s2342_s24 = sphi %s2412_s24, %s3065_s24   ;;  %s2338_s23 = sphi %s2410_s23, %s3057_s23   ;;  %s2334_s22 = sphi %s2408_s22, %s3064_s22   ;;  %s2330_s21 = sphi %s2406_s21, %s3063_s21   ;;  %s2326_s20 = sphi %s2404_s20, %s3062_s20   ;;  %s2322_s19 = sphi %s2402_s19, %s3061_s19   ;;  %s2318_s18 = sphi %s2400_s18, %s3055_s18   ;;  %s2314_s17 = sphi %s2398_s17, %s3060_s17   ;;  %s2310_s16 = sphi %s2396_s16, %s3059_s16   ;;  %s2306_s15 = sphi %s2394_s15, %s3054_s15  }
  0x12   : > { %3002 = sst [smem:[#allocation17_spill]] %s2310_s16  ;;  %s1584_s30 = sadd.s32 4294967294, %s2358_s28  }
  0x13   : > { %3003 = sst [smem:[#allocation18_spill]] %s2322_s19  ;;  %s38_s5 = sadd.s32 1, %s2350_s26 }
  0x14   : > { %3004 = sst [smem:[#allocation19_spill]] %s2338_s23  ;;  %s54_s6 = sadd.s32 1, %s2338_s23 }
  0x15   : > { %3005 = sst [smem:[#allocation20_spill]] %s2342_s24  ;;  %p2468_p0 = scmp.ge.s32.totalorder %s38_s5, 2 }
  0x16   : > { %3006 = sst [smem:[#allocation21_spill]] %s2346_s25  ;;  %p61_p1 = scmp.ne.s32.totalorder %s2338_s23, %s2334_s22 }
  0x17   : > { %3007 = sst [smem:[#allocation22_spill]] %s2358_s28  ;;  %p62_p2 = scmp.eq.s32.totalorder %s2358_s28, 0 }
  0x18   : > { %3008 = sst [smem:[#allocation23_spill]] %s2463_s29  ;;  %p67_p3 = scmp.ne.s32.totalorder %s2334_s22, %s2330_s21 }
  0x19   : > { %s3009_s7 = scalar_select %p2468_p0, 1, 0 }
  0x1a   : > { %s3070_s5 = smov (%p2468_p0, %s38_s5), 0  ;;  %p2480_p4 = por %p62_p2, %p61_p1 }
  0x1b   : > { %3010 = sst [smem:[#allocation24_spill]] %s3070_s5  ;;  %p68_p5 = scmp.eq.s32.totalorder %s2463_s29, 0 }
  0x1c   : > { %s2487_s9 = ssub.s32 %s2350_s26, %s3070_s5  ;;  %p141_p8 = scmp.ne.s32.totalorder %s2326_s20, %s2322_s19 }
  0x1d   : > { %p52_p6 = scmp.eq.s32.totalorder %s2487_s9, 0  ;;  %p2491_p7 = por %p68_p5, %p67_p3 }
  0x1e   : > { %p147_p9 = scmp.ne.s32.totalorder %s2322_s19, %s2318_s18  ;;  %p2502_p10 = por %p141_p8, %p62_p2 }
  0x1f   : > { %s3012_s11 = scalar_select %p2491_p7, 1, 0 }
  0x20   : > { %s2500_s12 = scalar_select %p52_p6, %s2338_s23, %s54_s6  }
  0x21   : > { %s3014_s13 = scalar_select %p2502_p10, 1, 0 }
  0x22   : > { %3013 = sst [smem:[#allocation25_spill]] %s2500_s12  ;;  %p2506_p11 = por %p147_p9, %p68_p5 }
  0x23   : > { %p172_p12 = scmp.ne.s32.totalorder %s2314_s17, %s2310_s16  ;;  %p173_p13 = scmp.eq.s32.totalorder %s2463_s29, 7 }
  0x24   : > { %s3015_s14 = scalar_select %p2506_p11, 1, 0 }
  0x25   : > { %p178_p1 = scmp.ne.s32.totalorder %s2310_s16, %s2306_s15  ;;  %p179_p3 = scmp.eq.s32.totalorder %s1584_s30, 7 }
  0x26   : > { %3016 = sst [smem:[#allocation26_spill]] %s3015_s14  ;;  %p2516_p7 = por %p173_p13, %p172_p12 }
  0x27   : > { %p2987_p6 = scmp.lt.s32.totalorder %s2358_s28, 8  ;;  %p2521_p0 = por %p179_p3, %p178_p1 }
  0x28   : > { %s3017_s10 = scalar_select %p2516_p7, 1, 0 }
  0x29   : > { %s3019_s18 = scalar_select %p2521_p0, 1, 0 }
  0x2a   : > { %3018 = sst [smem:[#allocation27_spill]] %s3017_s10  ;;  %s2526_s6 = sand.u32 1, %s2338_s23  }
  0x2b   : > { %3020 = sst [smem:[#allocation28_spill]] %s3019_s18  ;;  %p2532_p2 = pnand %p2987_p6, %p2480_p4 }
  0x2c   : > { %s220_s30 = sand.u32 1, %s2358_s28   ;;  %s2985_s5 = sshll.u32 %s2526_s6, 2 }
  0x2d   : > { %s2986_s12 = sshll.u32 %s2350_s26, 6  ;;  %s224_s15 = scalar_lea.vmem [#allocation6], %s2985_s5 }
  0x2e   : > { %s232_s4 = sshll.u32 %s224_s15, 4  ;;  %s3022_s1 = sld [smem:[#allocation29_spill]]  ;;  %s2548_s4 = int_to_ptr.vmem [resolvable:$true] %s232_s4 }
  0x2f   : > { %s2550_s8 = scalar_lea.sflag [#allocation7], %s220_s30  ;;  %p2556_p5 = pneg %p2532_p2 }
  0x34   : > { %s2546_s23 = scalar_lea.hbm %s3022_s1, %s2986_s12  ;;  %s2089_s18 = scalar_lea.hbm %s3022_s1, 128 }
  0x35   : > { %s2084_s25 = scalar_lea.hbm %s2546_s23, 64  ;;  %p2090_p12 = scmp.lt.u32.totalorder %s2546_s23, %s3022_s1 }
  0x36   : > { %p2085_p4 = scmp.ne.s32.totalorder %s2546_s23, %s2084_s25  ;;  %p2091_p13 = scmp.lt.u32.totalorder %s2089_s18, %s2084_s25 }
  0x37   : > { %p2093_p3 = scmp.lt.u32.totalorder %s2084_s25, %s2546_s23 }
  0x38   : > { %p2087_p8 = pnand %p2556_p5, %p2085_p4  ;;  %p2092_p1 = por %p2091_p13, %p2090_p12 }
  0x3a   : > { %p2088_p9 = pneg %p2087_p8  ;;  %p2094_p6 = por %p2093_p3, %p2092_p1 }
  0x3c   : > { %p2095_p0 = pnand %p2094_p6, %p2088_p9 }
  0x3e   : > { %2098 = shalt.err (!%p2095_p0)
}
  0x3f   : > { %s2099_s30 = scalar_lea.vmem %s2548_s4, 64  ;;  %s2360_s15 = smov [#allocation6]  }
  0x40   : > { %p2100_p4 = scmp.ne.s32.totalorder %s2548_s4, %s2099_s30  ;;  %s2104_s10 = sshll.u32 %s2360_s15, 4  ;;  %s2105_s10 = int_to_ptr.vmem [resolvable:$false] %s2104_s10 }
  0x41   : > { %s2106_s24 = scalar_lea.vmem %s2105_s10, 128  ;;  %p2107_p11 = scmp.lt.s32.totalorder %s2548_s4, %s2105_s10 }
  0x42   : > { %p2102_p8 = pnand %p2100_p4, %p2556_p5  ;;  %p2108_p10 = scmp.lt.s32.totalorder %s2106_s24, %s2099_s30 }
  0x44   : > { %p2103_p7 = pneg %p2102_p8  ;;  %p2109_p12 = por %p2108_p10, %p2107_p11 }
  0x46   : > { %p2110_p13 = pnand %p2109_p12, %p2103_p7 }
  0x48   : > { %2113 = shalt.err (!%p2110_p13)
}
  0x49   : > { %1763 = dma.hbm_to_vmem [thread:$0]  (!%p2532_p2), %s2546_s23, 64, %s2548_s4, %s2550_s8  }
  0x4a   : > { %s3024_s25 = sshll.u32 %s2350_s26, 6  ;;  %p3025_p0 = scmp.ne.s32.totalorder %s3014_s13, 0 }
  0x4b   : > { %s2585_s30 = scalar_lea.hbm %s2973_s2, %s3024_s25  ;;  %p3026_p7 = scmp.lt.s32.totalorder %s2358_s28, 8 }
  0x4c   : > { %p1601_p11 = scmp.ge.s32.totalorder %s2358_s28, 1  ;;  %p280_p6 = scmp.lt.s32.totalorder %s2358_s28, 9 }
  0x4d   : > { %p2591_p10 = pnand %p3026_p7, %p3025_p0  ;;  %s1587_s4 = sshll.u32 %s2526_s6, 5 }
  0x4e   : > { %p2597_p9 = pnand %p1601_p11, %p280_p6  ;;  %s1742_s23 = sshll.u32 %s2350_s26, 9 }
  0x4f   : > { %s3027_s15 = scalar_select %p2591_p10, 1, 0 }
  0x50   : > { %s3028_s10 = scalar_select %p2597_p9, 1, 0 }
  0x51   : > { %s2606_s25 = scalar_lea.hbm %s2971_s0, %s1742_s23  ;;  %s203_s13 = scalar_lea.vmem [#allocation3], %s1587_s4 }
  0x52   : > { %s213_s12 = sshll.u32 %s203_s13, 4  ;;  %s3029_s18 = sshll.u32 %s2526_s6, 2  ;;  %s2610_s12 = int_to_ptr.vmem [resolvable:$true] %s213_s12 }
  0x53   : > { %s243_s16 = scalar_lea.vmem [#allocation8], %s3029_s18  ;;  %s200_s14 = scalar_lea.sflag [#allocation4], %s2526_s6 }
  0x54   : > { %s251_s28 = sshll.u32 %s243_s16, 4  ;;  %s2114_s19 = scalar_lea.hbm %s2606_s25, 512  ;;  %s2612_s28 = int_to_ptr.vmem [resolvable:$true] %s251_s28 }
  0x55   : > { %p2115_p1 = scmp.ne.s32.totalorder %s2606_s25, %s2114_s19  ;;  %s2119_s24 = scalar_lea.hbm %s2971_s0, 1024 }
  0x56   : > { %p2120_p8 = scmp.lt.u32.totalorder %s2606_s25, %s2971_s0  ;;  %p2121_p12 = scmp.lt.u32.totalorder %s2119_s24, %s2114_s19 }
  0x57   : > { %p2117_p3 = pnand %p2115_p1, %p2556_p5  ;;  %p2123_p0 = scmp.lt.u32.totalorder %s2114_s19, %s2606_s25 }
  0x58   : > { %p2122_p13 = por %p2121_p12, %p2120_p8 }
  0x59   : > { %p2118_p4 = pneg %p2117_p3 }
  0x5a   : > { %p2124_p7 = por %p2123_p0, %p2122_p13 }
  0x5c   : > { %p2125_p11 = pnand %p2124_p7, %p2118_p4 }
  0x5e   : > { %2128 = shalt.err (!%p2125_p11)
}
  0x5f   : > { %s2129_s16 = scalar_lea.vmem %s2610_s12, 512  ;;  %s2361_s6 = smov [#allocation3]  }
  0x60   : > { %p2130_p6 = scmp.ne.s32.totalorder %s2610_s12, %s2129_s16  ;;  %s2134_s13 = sshll.u32 %s2361_s6, 4  ;;  %s2135_s13 = int_to_ptr.vmem [resolvable:$false] %s2134_s13 }
  0x61   : > { %s2136_s29 = scalar_lea.vmem %s2135_s13, 1024  ;;  %p2137_p9 = scmp.lt.s32.totalorder %s2610_s12, %s2135_s13 }
  0x62   : > { %p2132_p1 = pnand %p2130_p6, %p2556_p5  ;;  %p2138_p10 = scmp.lt.s32.totalorder %s2136_s29, %s2129_s16 }
  0x64   : > { %p2133_p3 = pneg %p2132_p1  ;;  %p2139_p8 = por %p2138_p10, %p2137_p9 }
  0x66   : > { %p2140_p12 = pnand %p2139_p8, %p2133_p3 }
  0x68   : > { %2143 = shalt.err (!%p2140_p12)
}
  0x69   : > { %1760 = dma.hbm_to_vmem [thread:$0]  (!%p2532_p2), %s2606_s25, 512, %s2610_s12, %s200_s14  }
  0x6a   : > { %s2144_s19 = scalar_lea.hbm %s2585_s30, 64  ;;  %s2149_s23 = scalar_lea.hbm %s2973_s2, 128 }
  0x6b   : > { %p2145_p4 = scmp.ne.s32.totalorder %s2585_s30, %s2144_s19  ;;  %p2150_p10 = scmp.lt.u32.totalorder %s2585_s30, %s2973_s2 }
  0x6c   : > { %p2151_p9 = scmp.lt.u32.totalorder %s2149_s23, %s2144_s19  ;;  %p2153_p11 = scmp.lt.u32.totalorder %s2144_s19, %s2585_s30 }
  0x6d   : > { %p2147_p13 = pnand %p2145_p4, %p2556_p5 }
  0x6e   : > { %p2152_p7 = por %p2151_p9, %p2150_p10 }
  0x6f   : > { %p2148_p0 = pneg %p2147_p13 }
  0x70   : > { %p2154_p6 = por %p2153_p11, %p2152_p7 }
  0x72   : > { %p2155_p1 = pnand %p2154_p6, %p2148_p0 }
  0x74   : > { %2158 = shalt.err (!%p2155_p1)
}
  0x75   : > { %s2159_s14 = scalar_lea.vmem %s2612_s28, 64  ;;  %s2362_s25 = smov [#allocation8]  }
  0x76   : > { %p2160_p3 = scmp.ne.s32.totalorder %s2612_s28, %s2159_s14  ;;  %s2164_s12 = sshll.u32 %s2362_s25, 4  ;;  %s2165_s12 = int_to_ptr.vmem [resolvable:$false] %s2164_s12 }
  0x77   : > { %s2166_s16 = scalar_lea.vmem %s2165_s12, 128  ;;  %p2167_p4 = scmp.lt.s32.totalorder %s2612_s28, %s2165_s12 }
  0x78   : > { %p2162_p8 = pnand %p2160_p3, %p2556_p5  ;;  %p2168_p13 = scmp.lt.s32.totalorder %s2166_s16, %s2159_s14 }
  0x7a   : > { %p2163_p12 = pneg %p2162_p8  ;;  %p2169_p10 = por %p2168_p13, %p2167_p4 }
  0x7c   : > { %p2170_p9 = pnand %p2169_p10, %p2163_p12 }
  0x7e   : > { %2173 = shalt.err (!%p2170_p9)
}
  0x7f   : > { %1766 = dma.hbm_to_vmem [thread:$0]  (!%p2532_p2), %s2585_s30, 64, %s2612_s28, %s2550_s8  }
  0x80   : > { %s258_s5 = sand.u32 1, %s2326_s20   ;;  %s41_s6 = sadd.s32 1, %s2354_s27 }
  0x81   : > { %s1596_s13 = sshll.u32 %s258_s5, 10  ;;  %p3030_p5 = scmp.ne.s32.totalorder %s3009_s7, 0 }
  0x82   : > { %s1598_s21 = sshll.u32 %s2354_s27, 2  ;;  %s1745_s29 = sshll.u32 %s2350_s26, 10 }
  0x83   : > { %s3072_s6 = smov (!%p3030_p5, %s41_s6), %s2354_s27  ;;  %s269_s19 = sadd.s32 %s1745_s29, %s1598_s21 }
  0x84   : > { %p43_p0 = scmp.ge.s32.totalorder %s3072_s6, 4  ;;  %s262_s18 = scalar_lea.vmem [#allocation9], %s1596_s13 }
  0x85   : > { %s272_s1 = sshll.u32 %s262_s18, 4  ;;  %s1600_s28 = sshll.u32 %s269_s19, 6  ;;  %s2667_s1 = int_to_ptr.vmem [resolvable:$true] %s272_s1 }
  0x86   : > { %s3074_s6 = smov (%p43_p0, %s3072_s6), 0  ;;  %s2674_s23 = scalar_lea.hbm %s2974_s3, %s1600_s28 }
  0x87   : > { %s130_s7 = ssub.s32 %s2354_s27, %s3074_s6  ;;  %s3031_s4 = sadd.s32 1, %s2314_s17 }
  0x88   : > { %s131_s24 = sor.u32 %s130_s7, %s2487_s9  ;;  %p160_p2 = scmp.eq.s32.totalorder %s130_s7, 0 }
  0x89   : > { %p132_p7 = scmp.eq.s32.totalorder %s131_s24, 0  ;;  %s3032_s25 = sadd.s32 1, %s2326_s20 }
  0x8a   : > { %s2680_s14 = scalar_select %p160_p2, %s2314_s17, %s3031_s4  }
  0x8b   : > { %s2685_s12 = scalar_select %p132_p7, %s2326_s20, %s3032_s25  }
  0x8c   : > { %s2687_s16 = scalar_lea.sflag [#allocation10], %s258_s5  ;;  %s2174_s13 = scalar_lea.hbm %s2674_s23, 16384 }
  0x8d   : > { %p2175_p11 = scmp.ne.s32.totalorder %s2674_s23, %s2174_s13  ;;  %p3033_p6 = scmp.ne.s32.totalorder %s3027_s15, 0 }
  0x8e   : > { %s2179_s29 = scalar_lea.hbm %s2974_s3, 131072  ;;  %p2180_p12 = scmp.lt.u32.totalorder %s2674_s23, %s2974_s3 }
  0x8f   : > { %p2176_p1 = pneg %p3033_p6  ;;  %p2181_p4 = scmp.lt.u32.totalorder %s2179_s29, %s2174_s13 }
  0x90   : > { %p2183_p10 = scmp.lt.u32.totalorder %s2174_s13, %s2674_s23 }
  0x91   : > { %p2177_p3 = pnand %p2176_p1, %p2175_p11  ;;  %p2182_p13 = por %p2181_p4, %p2180_p12 }
  0x93   : > { %p2178_p8 = pneg %p2177_p3  ;;  %p2184_p9 = por %p2183_p10, %p2182_p13 }
  0x95   : > { %p2185_p5 = pnand %p2184_p9, %p2178_p8 }
  0x97   : > { %2188 = shalt.err (!%p2185_p5)
}
  0x98   : > { %s2189_s5 = scalar_lea.vmem %s2667_s1, 16384  ;;  %s2363_s28 = smov [#allocation9]  }
  0x99   : > { %p2190_p0 = scmp.ne.s32.totalorder %s2667_s1, %s2189_s5  ;;  %s2194_s7 = sshll.u32 %s2363_s28, 4  ;;  %s2195_s7 = int_to_ptr.vmem [resolvable:$false] %s2194_s7 }
  0x9a   : > { %s2196_s8 = scalar_lea.vmem %s2195_s7, 32768  ;;  %p2197_p11 = scmp.lt.s32.totalorder %s2667_s1, %s2195_s7 }
  0x9b   : > { %p2192_p2 = pnand %p2190_p0, %p2176_p1  ;;  %p2198_p3 = scmp.lt.s32.totalorder %s2196_s8, %s2189_s5 }
  0x9d   : > { %p2193_p7 = pneg %p2192_p2  ;;  %p2199_p12 = por %p2198_p3, %p2197_p11 }
  0x9f   : > { %p2200_p4 = pnand %p2199_p12, %p2193_p7 }
  0xa1   : > { %2203 = shalt.err (!%p2200_p4)
}
  0xa2   : > { %s2364_s30 = smov 1024   ;;  %s2365_s24 = smov 256  }
  0xa3   : > { %s2366_s4 = smov 16   ;;  %p3034_p1 = scmp.ne.s32.totalorder %s3028_s10, 0 }
  0xa4   : > { %1769 = dma.hbm_to_vmem [thread:$0]  (!%p3033_p6), %s2674_s23, 16384, %s2667_s1, %s2687_s16, %s2364_s30, %s2365_s24, %s2366_s4  }
  0xa5   : > { %284 = sbr.rel (%p3034_p1) target bundleno = 590 (0x24e), region = 36  ;;  %s286_s25 = sand.u32 (!%p3034_p1), 1, %s2334_s22  }
  0xa6   : > { %s1602_s13 = sshll.u32 (!%p3034_p1), %s286_s25, 5  ;;  %s287_s21 = scalar_lea.sflag (!%p3034_p1), [#allocation4], %s286_s25 }
  0xa7   : > { %s2718_s9 = scalar_lea.vmem (!%p3034_p1), [#allocation3], %s1602_s13  ;;  %p3035_p8 = scmp.ne.s32.totalorder (!%p3034_p1), %s3012_s11, 0 }
  0xac   : > { %2289 = dma.done.wait (%p3035_p8), %s287_s21, 512  }
  0xad   : > { %2291 = vsyncadd (%p3035_p8), %s287_s21, 4294966784  ;;  %s3036_s29 = sld [smem:[#allocation23_spill]]  ;;  %s1603_s15 = sshll.u32 %s286_s25, 2 }
  0xae   : > { %s2725_s23 = scalar_lea.vmem [#allocation6], %s1603_s15 }
  0xb3   : > { %s295_s19 = sand.u32 1, %s3036_s29  }
  0xb4   : > { %s296_s1 = scalar_lea.sflag [#allocation7], %s295_s19 }
  0xb5   : > { %2293 = dma.done.wait (%p3035_p8), %s296_s1, 128  }
  0xb6   : > { %2295 = vsyncadd (%p3035_p8), %s296_s1, 4294967168  ;;  %s3037_s10 = sld [smem:[#allocation18_spill]]  ;;  %s3038_s16 = sld [smem:[#allocation26_spill]] }
  0xb7   : > { %s2732_s28 = scalar_lea.vmem [#allocation8], %s1603_s15 }
  0xbc   : > { %s313_s18 = sand.u32 1, %s3037_s10   ;;  %p3039_p6 = scmp.ne.s32.totalorder %s3038_s16, 0 }
  0xbd   : > { %s1605_s5 = sshll.u32 %s313_s18, 10  ;;  %s314_s7 = scalar_lea.sflag [#allocation10], %s313_s18 }
  0xbe   : > { %s2734_s8 = scalar_lea.vmem [#allocation9], %s1605_s5 }
  0xbf   : > { %2297 = dma.done.wait (%p3039_p6), %s314_s7, 16384  }
  0xc0   : > { %2299 = vsyncadd (%p3039_p6), %s314_s7, 4294950912  ;;  %s3040_s30 = sld [smem:[#allocation17_spill]]  ;;  %s3041_s25 = sld [smem:[#allocation20_spill]] }
  0xc6   : > { %s354_s24 = sand.u32 1, %s3040_s30   ;;  %p1607_p13 = scmp.ne.s32.totalorder %s3041_s25, 0 }
  0xc7   : > { %s1606_s11 = sshll.u32 %s354_s24, 5  ;;  %v2367_v0 = vmov (!%p1607_p13), 0.0  }
  0xc8   : > { %s2743_s4 = scalar_lea.vmem [#allocation11], %s1606_s11  ;;  %366 = sbr.rel (%p1607_p13) target bundleno = 207 (0xcf), region = 56  ;;  %367 = vst [vmem:[#allocation2] sm:$0xff] (!%p1607_p13), %v2367_v0  ;;  %368 = vst [vmem:[#allocation2 + $0x8] sm:$0xff] (!%p1607_p13), %v2367_v0 }
  0xc9   : > { %369 = vst [vmem:[#allocation2 + $0x10] sm:$0xff] (!%p1607_p13), %v2367_v0  ;;  %370 = vst [vmem:[#allocation2 + $0x18] sm:$0xff] (!%p1607_p13), %v2367_v0 }
  0xcf PF: > { %v1892_v1 = vld [vmem:[%s2734_s8 + $0x4] ss:$16 sps:$4 sm:$0xff]   ;;  %v1896_v3 = vld [vmem:[%s2734_s8] ss:$16 sps:$4 sm:$0xff]   ;;  %v377_v38 = vlaneseq  ;;  %v372_v54 = vld [vmem:[%s2718_s9 + $0x8] sm:$0xff]  ;;  %s3042_s13 = sld [smem:[#allocation20_spill]] }
  0xd0   : > { %v1894_v2 = vld [vmem:[%s2734_s8 + $0x204] ss:$16 sps:$4 sm:$0xff]   ;;  %1223 = vmatprep.subr.bf16.mxu0 %v1892_v1  ;;  %v1897_v4 = vld [vmem:[%s2734_s8 + $0x200] ss:$16 sps:$4 sm:$0xff]   ;;  %v375_v56 = vld [vmem:[%s2732_s28] sm:$0xf] }
  0xd1   : > { %1264 = vmatprep.subr.bf16.mxu1 %v1894_v2  ;;  %v1898_v5 = vld [vmem:[%s2734_s8 + $0x24] ss:$16 sps:$4 sm:$0xff]   ;;  %1224 = vmatpush1.bf16.msra.mxu0 %v1896_v3  ;;  %v1902_v7 = vld [vmem:[%s2734_s8 + $0x20] ss:$16 sps:$4 sm:$0xff]   ;;  %v378_v43 = vshrl.u32 %v377_v38, 7  ;;  %v374_v58 = vld [vmem:[%s2718_s9 + $0x18] sm:$0xff] }
  0xd2   : > { %1265 = vmatpush1.bf16.msra.mxu1 %v1897_v4  ;;  %v1900_v6 = vld [vmem:[%s2734_s8 + $0x224] ss:$16 sps:$4 sm:$0xff]   ;;  %1225 = vmatprep.subr.bf16.mxu0 %v1898_v5  ;;  %v1903_v8 = vld [vmem:[%s2734_s8 + $0x220] ss:$16 sps:$4 sm:$0xff]  }
  0xd3   : > { %1266 = vmatprep.subr.bf16.mxu1 %v1900_v6  ;;  %v1904_v9 = vld [vmem:[%s2734_s8 + $0x44] ss:$16 sps:$4 sm:$0xff]   ;;  %v1908_v11 = vld [vmem:[%s2734_s8 + $0x40] ss:$16 sps:$4 sm:$0xff]   ;;  %v383_v48 = vsub.s32 1, %v378_v43  ;;  %v391_v49 = vsub.s32 3, %v378_v43 }
  0xd4   : > { %v1906_v10 = vld [vmem:[%s2734_s8 + $0x244] ss:$16 sps:$4 sm:$0xff]   ;;  %v1909_v12 = vld [vmem:[%s2734_s8 + $0x240] ss:$16 sps:$4 sm:$0xff]   ;;  %v379_v51 = vsub.s32 0, %v378_v43  ;;  %v387_v55 = vsub.s32 2, %v378_v43 }
  0xd5   : > { %1226 = vmatpush1.bf16.msra.mxu0 %v1902_v7  ;;  %v1910_v13 = vld [vmem:[%s2734_s8 + $0x64] ss:$16 sps:$4 sm:$0xff]   ;;  %v1914_v15 = vld [vmem:[%s2734_s8 + $0x60] ss:$16 sps:$4 sm:$0xff]   ;;  %v384_v60 = vrot.slane %v375_v56, %v383_v48  ;;  %v392_v62 = vrot.slane %v375_v56, %v391_v49  ;;  %p1736_p10 = scmp.ne.s32.totalorder %s3042_s13, 1 }
  0xd6   : > { %1267 = vmatpush1.bf16.msra.mxu1 %v1903_v8  ;;  %1227 = vmatprep.subr.bf16.mxu0 %v1904_v9  ;;  %v1912_v14 = vld [vmem:[%s2734_s8 + $0x264] ss:$16 sps:$4 sm:$0xff]   ;;  %v1915_v16 = vld [vmem:[%s2734_s8 + $0x260] ss:$16 sps:$4 sm:$0xff]   ;;  %v380_v2 = vrot.slane %v375_v56, %v379_v51  ;;  %v388_v7 = vrot.slane %v375_v56, %v387_v55  ;;  %v1991_v56 = vld [vmem:[%s2734_s8 + $0x208] ss:$16 sps:$4 sm:$0xff]  }
  0xd7   : > { %1268 = vmatprep.subr.bf16.mxu1 %v1906_v10  ;;  %v1916_v17 = vld [vmem:[%s2734_s8 + $0x84] ss:$16 sps:$4 sm:$0xff]   ;;  %v1920_v19 = vld [vmem:[%s2734_s8 + $0x80] ss:$16 sps:$4 sm:$0xff]   ;;  %v398_v5 = vmul.f32 %v384_v60, %v372_v54  ;;  %v400_v6 = vmul.f32 %v392_v62, %v374_v58  ;;  %v1999_v58 = vld [vmem:[%s2734_s8 + $0x22c] ss:$16 sps:$4 sm:$0xff]  }
  0xd8   : > { %v1918_v18 = vld [vmem:[%s2734_s8 + $0x284] ss:$16 sps:$4 sm:$0xff]   ;;  %v1921_v20 = vld [vmem:[%s2734_s8 + $0x280] ss:$16 sps:$4 sm:$0xff]   ;;  %v1997_v60 = vld [vmem:[%s2734_s8 + $0x228] ss:$16 sps:$4 sm:$0xff]  }
  0xd9   : > { %1228 = vmatpush1.bf16.msra.mxu0 %v1908_v11  ;;  %v1922_v21 = vld [vmem:[%s2734_s8 + $0xa4] ss:$16 sps:$4 sm:$0xff]   ;;  %v1926_v23 = vld [vmem:[%s2734_s8 + $0xa0] ss:$16 sps:$4 sm:$0xff]   ;;  %v2005_v62 = vld [vmem:[%s2734_s8 + $0x24c] ss:$16 sps:$4 sm:$0xff]  }
  0xda   : > { %1269 = vmatpush1.bf16.msra.mxu1 %v1909_v12  ;;  %1229 = vmatprep.subr.bf16.mxu0 %v1910_v13  ;;  %v1924_v22 = vld [vmem:[%s2734_s8 + $0x2a4] ss:$16 sps:$4 sm:$0xff]   ;;  %v1927_v24 = vld [vmem:[%s2734_s8 + $0x2a0] ss:$16 sps:$4 sm:$0xff]  }
  0xdb   : > { %1270 = vmatprep.subr.bf16.mxu1 %v1912_v14  ;;  %v1928_v25 = vld [vmem:[%s2734_s8 + $0xc4] ss:$16 sps:$4 sm:$0xff]   ;;  %v1932_v27 = vld [vmem:[%s2734_s8 + $0xc0] ss:$16 sps:$4 sm:$0xff]  }
  0xdc   : > { %v1930_v26 = vld [vmem:[%s2734_s8 + $0x2c4] ss:$16 sps:$4 sm:$0xff]   ;;  %v1933_v28 = vld [vmem:[%s2734_s8 + $0x2c0] ss:$16 sps:$4 sm:$0xff]  }
  0xdd   : > { %1230 = vmatpush1.bf16.msra.mxu0 %v1914_v15  ;;  %v1934_v29 = vld [vmem:[%s2734_s8 + $0xe4] ss:$16 sps:$4 sm:$0xff]   ;;  %v1938_v31 = vld [vmem:[%s2734_s8 + $0xe0] ss:$16 sps:$4 sm:$0xff]  }
  0xde   : > { %1271 = vmatpush1.bf16.msra.mxu1 %v1915_v16  ;;  %1231 = vmatprep.subr.bf16.mxu0 %v1916_v17  ;;  %v1936_v30 = vld [vmem:[%s2734_s8 + $0x2e4] ss:$16 sps:$4 sm:$0xff]   ;;  %v1939_v32 = vld [vmem:[%s2734_s8 + $0x2e0] ss:$16 sps:$4 sm:$0xff]  }
  0xdf   : > { %1272 = vmatprep.subr.bf16.mxu1 %v1918_v18  ;;  %v1940_v33 = vld [vmem:[%s2734_s8 + $0x104] ss:$16 sps:$4 sm:$0xff]   ;;  %v1944_v35 = vld [vmem:[%s2734_s8 + $0x100] ss:$16 sps:$4 sm:$0xff]  }
  0xe0   : > { %v1942_v34 = vld [vmem:[%s2734_s8 + $0x304] ss:$16 sps:$4 sm:$0xff]   ;;  %v1945_v36 = vld [vmem:[%s2734_s8 + $0x300] ss:$16 sps:$4 sm:$0xff]  }
  0xe1   : > { %1232 = vmatpush1.bf16.msra.mxu0 %v1920_v19  ;;  %v1946_v37 = vld [vmem:[%s2734_s8 + $0x124] ss:$16 sps:$4 sm:$0xff]   ;;  %v1950_v40 = vld [vmem:[%s2734_s8 + $0x120] ss:$16 sps:$4 sm:$0xff]  }
  0xe2   : > { %1273 = vmatpush1.bf16.msra.mxu1 %v1921_v20  ;;  %1233 = vmatprep.subr.bf16.mxu0 %v1922_v21  ;;  %v1948_v39 = vld [vmem:[%s2734_s8 + $0x324] ss:$16 sps:$4 sm:$0xff]   ;;  %v1951_v41 = vld [vmem:[%s2734_s8 + $0x320] ss:$16 sps:$4 sm:$0xff]  }
  0xe3   : > { %1274 = vmatprep.subr.bf16.mxu1 %v1924_v22  ;;  %v1952_v42 = vld [vmem:[%s2734_s8 + $0x144] ss:$16 sps:$4 sm:$0xff]   ;;  %v1956_v45 = vld [vmem:[%s2734_s8 + $0x140] ss:$16 sps:$4 sm:$0xff]  }
  0xe4   : > { %v1954_v44 = vld [vmem:[%s2734_s8 + $0x344] ss:$16 sps:$4 sm:$0xff]   ;;  %v1957_v46 = vld [vmem:[%s2734_s8 + $0x340] ss:$16 sps:$4 sm:$0xff]  }
  0xe5   : > { %1234 = vmatpush1.bf16.msra.mxu0 %v1926_v23  ;;  %v1958_v47 = vld [vmem:[%s2734_s8 + $0x164] ss:$16 sps:$4 sm:$0xff]   ;;  %v1962_v52 = vld [vmem:[%s2734_s8 + $0x160] ss:$16 sps:$4 sm:$0xff]  }
  0xe6   : > { %1275 = vmatpush1.bf16.msra.mxu1 %v1927_v24  ;;  %1235 = vmatprep.subr.bf16.mxu0 %v1928_v25  ;;  %v1960_v50 = vld [vmem:[%s2734_s8 + $0x364] ss:$16 sps:$4 sm:$0xff]   ;;  %v1963_v53 = vld [vmem:[%s2734_s8 + $0x360] ss:$16 sps:$4 sm:$0xff]  }
  0xe7   : > { %1276 = vmatprep.subr.bf16.mxu1 %v1930_v26  ;;  %v401_v57 = vld [vmem:[%s2725_s23] sm:$0xf]  ;;  %v373_v4 = vld [vmem:[%s2718_s9 + $0x10] sm:$0xff] }
  0xe8   : > { %v1964_v59 = vld [vmem:[%s2734_s8 + $0x184] ss:$16 sps:$4 sm:$0xff]   ;;  %v410_v61 = vrot.slane %v401_v57, %v383_v48  ;;  %v418_v1 = vrot.slane %v401_v57, %v391_v49  ;;  %v406_v3 = vrot.slane %v401_v57, %v379_v51  ;;  %v414_v8 = vrot.slane %v401_v57, %v387_v55  ;;  %v1968_v10 = vld [vmem:[%s2734_s8 + $0x180] ss:$16 sps:$4 sm:$0xff]   ;;  %v1990_v51 = vld [vmem:[%s2734_s8 + $0xc] ss:$16 sps:$4 sm:$0xff]  }
  0xe9   : > { %1236 = vmatpush1.bf16.msra.mxu0 %v1932_v27  ;;  %v371_v63 = vld [vmem:[%s2718_s9] sm:$0xff]  ;;  %v399_v14 = vmul.f32 %v388_v7, %v373_v4  ;;  %v1988_v55 = vld [vmem:[%s2734_s8 + $0x8] ss:$16 sps:$4 sm:$0xff]   ;;  %v1996_v57 = vld [vmem:[%s2734_s8 + $0x2c] ss:$16 sps:$4 sm:$0xff]  }
  0xea   : > { %1277 = vmatpush1.bf16.msra.mxu1 %v1933_v28  ;;  %1237 = vmatprep.subr.bf16.mxu0 %v1934_v29  ;;  %v1966_v0 = vld [vmem:[%s2734_s8 + $0x384] ss:$16 sps:$4 sm:$0xff]   ;;  %v397_v9 = vmul.f32 %v380_v2, %v371_v63  ;;  %v1969_v11 = vld [vmem:[%s2734_s8 + $0x380] ss:$16 sps:$4 sm:$0xff]   ;;  %v424_v12 = vadd.f32 %v410_v61, %v398_v5  ;;  %v426_v13 = vadd.f32 %v418_v1, %v400_v6  ;;  %v2002_v61 = vld [vmem:[%s2734_s8 + $0x4c] ss:$16 sps:$4 sm:$0xff]  }
  0xeb   : > { %1278 = vmatprep.subr.bf16.mxu1 %v1936_v30  ;;  %v1970_v15 = vld [vmem:[%s2734_s8 + $0x1a4] ss:$16 sps:$4 sm:$0xff]   ;;  %v425_v20 = vadd.f32 %v414_v8, %v399_v14  ;;  %v1974_v22 = vld [vmem:[%s2734_s8 + $0x1a0] ss:$16 sps:$4 sm:$0xff]   ;;  %v2000_v63 = vld [vmem:[%s2734_s8 + $0x48] ss:$16 sps:$4 sm:$0xff]  }
  0xec   : > { %v1972_v16 = vld [vmem:[%s2734_s8 + $0x3a4] ss:$16 sps:$4 sm:$0xff]   ;;  %v423_v17 = vadd.f32 %v406_v3, %v397_v9  ;;  %v428_v18 = vmul.f32 255.0, %v424_v12  ;;  %v430_v19 = vmul.f32 255.0, %v426_v13  ;;  %v1975_v23 = vld [vmem:[%s2734_s8 + $0x3a0] ss:$16 sps:$4 sm:$0xff]  }
  0xed   : > { %1238 = vmatpush1.bf16.msra.mxu0 %v1938_v31  ;;  %v429_v26 = vmul.f32 255.0, %v425_v20  ;;  %v1976_v27 = vld [vmem:[%s2734_s8 + $0x1c4] ss:$16 sps:$4 sm:$0xff]   ;;  %v2008_v1 = vld [vmem:[%s2734_s8 + $0x6c] ss:$16 sps:$4 sm:$0xff]  }
  0xee   : > { %1279 = vmatpush1.bf16.msra.mxu1 %v1939_v32  ;;  %1239 = vmatprep.subr.bf16.mxu0 %v1940_v33  ;;  %v427_v21 = vmul.f32 255.0, %v423_v17  ;;  %v432_v24 = vfloor.f32 %v428_v18  ;;  %v434_v25 = vfloor.f32 %v430_v19  ;;  %v1978_v28 = vld [vmem:[%s2734_s8 + $0x3c4] ss:$16 sps:$4 sm:$0xff]   ;;  %v1980_v33 = vld [vmem:[%s2734_s8 + $0x1c0] ss:$16 sps:$4 sm:$0xff]  }
  0xef   : > { %1280 = vmatprep.subr.bf16.mxu1 %v1942_v34  ;;  %v433_v32 = vfloor.f32 %v429_v26  ;;  %v2011_v2 = vld [vmem:[%s2734_s8 + $0x26c] ss:$16 sps:$4 sm:$0xff]   ;;  %v2006_v3 = vld [vmem:[%s2734_s8 + $0x68] ss:$16 sps:$4 sm:$0xff]  }
  0xf0   : > { %v431_v29 = vfloor.f32 %v427_v21  ;;  %v436_v30 = vmax.f32 %v432_v24, 0.0  ;;  %v438_v31 = vmax.f32 %v434_v25, 0.0  ;;  %v2009_v4 = vld [vmem:[%s2734_s8 + $0x268] ss:$16 sps:$4 sm:$0xff]   ;;  %v2014_v5 = vld [vmem:[%s2734_s8 + $0x8c] ss:$16 sps:$4 sm:$0xff]  }
  0xf1   : > { %1240 = vmatpush1.bf16.msra.mxu0 %v1944_v35  ;;  %v1981_v35 = vld [vmem:[%s2734_s8 + $0x3c0] ss:$16 sps:$4 sm:$0xff]   ;;  %v437_v38 = vmax.f32 %v433_v32, 0.0  ;;  %v2017_v6 = vld [vmem:[%s2734_s8 + $0x28c] ss:$16 sps:$4 sm:$0xff]  }
  0xf2   : > { %1281 = vmatpush1.bf16.msra.mxu1 %v1945_v36  ;;  %1241 = vmatprep.subr.bf16.mxu0 %v1946_v37  ;;  %v435_v34 = vmax.f32 %v431_v29, 0.0  ;;  %v440_v36 = vmin.f32 %v436_v30, 255.0  ;;  %v442_v37 = vmin.f32 %v438_v31, 255.0  ;;  %v2012_v7 = vld [vmem:[%s2734_s8 + $0x88] ss:$16 sps:$4 sm:$0xff]  }
  0xf3   : > { %1282 = vmatprep.subr.bf16.mxu1 %v1948_v39  ;;  %v1982_v39 = vld [vmem:[%s2734_s8 + $0x1e4] ss:$16 sps:$4 sm:$0xff]   ;;  %v2015_v8 = vld [vmem:[%s2734_s8 + $0x288] ss:$16 sps:$4 sm:$0xff]   ;;  %v2020_v9 = vld [vmem:[%s2734_s8 + $0xac] ss:$16 sps:$4 sm:$0xff]  }
  0xf4   : > { %v446_v43 = vmul.f32 0.003921569, %v442_v37  ;;  %v2021_v12 = vld [vmem:[%s2734_s8 + $0x2a8] ss:$16 sps:$4 sm:$0xff]   ;;  %v2026_v13 = vld [vmem:[%s2734_s8 + $0xcc] ss:$16 sps:$4 sm:$0xff]  }
  0xf5   : > { %1242 = vmatpush1.bf16.msra.mxu0 %v1950_v40  ;;  %v1984_v40 = vld [vmem:[%s2734_s8 + $0x3e4] ss:$16 sps:$4 sm:$0xff]   ;;  %v2029_v14 = vld [vmem:[%s2734_s8 + $0x2cc] ss:$16 sps:$4 sm:$0xff]   ;;  %v2030_v19 = vld [vmem:[%s2734_s8 + $0xe8] ss:$16 sps:$4 sm:$0xff]  }
  0xf6   : > { %1283 = vmatpush1.bf16.msra.mxu1 %v1951_v41  ;;  %1243 = vmatprep.subr.bf16.mxu0 %v1952_v42  ;;  %v439_v41 = vmin.f32 %v435_v34, 255.0  ;;  %v444_v42 = vmul.f32 0.003921569, %v440_v36  ;;  %v450_v49 = vpack.c.bf16 %v446_v43, %v446_v43  ;;  %v2032_v17 = vld [vmem:[%s2734_s8 + $0xec] ss:$16 sps:$4 sm:$0xff]  }
  0xf7   : > { %1284 = vmatprep.subr.bf16.mxu1 %v1954_v44  ;;  %v441_v44 = vmin.f32 %v437_v38, 255.0  ;;  %v2035_v18 = vld [vmem:[%s2734_s8 + $0x2ec] ss:$16 sps:$4 sm:$0xff]   ;;  %v2033_v20 = vld [vmem:[%s2734_s8 + $0x2e8] ss:$16 sps:$4 sm:$0xff]  }
  0xf8   : > { %v448_v48 = vpack.c.bf16 %v444_v42, %v444_v42  ;;  %1296 = vmatprep.mubr.bf16.mxu1 %v450_v49  ;;  %v2038_v21 = vld [vmem:[%s2734_s8 + $0x10c] ss:$16 sps:$4 sm:$0xff]   ;;  %v2039_v24 = vld [vmem:[%s2734_s8 + $0x308] ss:$16 sps:$4 sm:$0xff]  }
  0xf9   : > { %1244 = vmatpush1.bf16.msra.mxu0 %v1956_v45  ;;  %v443_v45 = vmul.f32 0.003921569, %v439_v41  ;;  %v2044_v25 = vld [vmem:[%s2734_s8 + $0x12c] ss:$16 sps:$4 sm:$0xff]   ;;  %v2048_v31 = vld [vmem:[%s2734_s8 + $0x148] ss:$16 sps:$4 sm:$0xff]  }
  0xfa   : > { %1285 = vmatpush1.bf16.msra.mxu1 %v1957_v46  ;;  %1245 = vmatprep.subr.bf16.mxu0 %v1958_v47  ;;  %v1986_v46 = vld [vmem:[%s2734_s8 + $0x1e0] ss:$16 sps:$4 sm:$0xff]   ;;  %v2047_v26 = vld [vmem:[%s2734_s8 + $0x32c] ss:$16 sps:$4 sm:$0xff]   ;;  %v2051_v32 = vld [vmem:[%s2734_s8 + $0x348] ss:$16 sps:$4 sm:$0xff]  }
  0xfb   : > { %1286 = vmatprep.subr.bf16.mxu1 %v1960_v50  ;;  %v1987_v47 = vld [vmem:[%s2734_s8 + $0x3e0] ss:$16 sps:$4 sm:$0xff]   ;;  %v445_v50 = vmul.f32 0.003921569, %v441_v44  ;;  %1255 = vmatprep.mubr.bf16.mxu0 %v448_v48  ;;  %v2050_v29 = vld [vmem:[%s2734_s8 + $0x14c] ss:$16 sps:$4 sm:$0xff]  }
  0xfc   : > { %v2053_v30 = vld [vmem:[%s2734_s8 + $0x34c] ss:$16 sps:$4 sm:$0xff]   ;;  %v2057_v36 = vld [vmem:[%s2734_s8 + $0x368] ss:$16 sps:$4 sm:$0xff]  }
  0xfd   : > { %1246 = vmatpush1.bf16.msra.mxu0 %v1962_v52  ;;  %v1993_v52 = vld [vmem:[%s2734_s8 + $0x20c] ss:$16 sps:$4 sm:$0xff]   ;;  %v2820_v54 = vpack.c.bf16 %v445_v50, %v445_v50  ;;  %v2066_v43 = vld [vmem:[%s2734_s8 + $0x1a8] ss:$16 sps:$4 sm:$0xff]  }
  0xfe   : > { %1287 = vmatpush1.bf16.msra.mxu1 %v1963_v53  ;;  %1247 = vmatprep.subr.bf16.mxu0 %v1964_v59  ;;  %v2818_v53 = vpack.c.bf16 %v443_v45, %v443_v45  ;;  %v1994_v59 = vld [vmem:[%s2734_s8 + $0x28] ss:$16 sps:$4 sm:$0xff]   ;;  %v2059_v34 = vld [vmem:[%s2734_s8 + $0x36c] ss:$16 sps:$4 sm:$0xff]  }
  0xff   : > { %1288 = vmatprep.subr.bf16.mxu1 %v1966_v0  ;;  %v2003_v0 = vld [vmem:[%s2734_s8 + $0x248] ss:$16 sps:$4 sm:$0xff]   ;;  %v2062_v37 = vld [vmem:[%s2734_s8 + $0x18c] ss:$16 sps:$4 sm:$0xff]  }
 0x100   : > { %v2065_v38 = vld [vmem:[%s2734_s8 + $0x38c] ss:$16 sps:$4 sm:$0xff]   ;;  %v2069_v44 = vld [vmem:[%s2734_s8 + $0x3a8] ss:$16 sps:$4 sm:$0xff]  }
 0x101   : > { %1248 = vmatpush1.bf16.msra.mxu0 %v1968_v10  ;;  %v2023_v10 = vld [vmem:[%s2734_s8 + $0x2ac] ss:$16 sps:$4 sm:$0xff]  }
 0x102   : > { %1289 = vmatpush1.bf16.msra.mxu1 %v1969_v11  ;;  %1249 = vmatprep.subr.bf16.mxu0 %v1970_v15  ;;  %v2018_v11 = vld [vmem:[%s2734_s8 + $0xa8] ss:$16 sps:$4 sm:$0xff]   ;;  %v2068_v41 = vld [vmem:[%s2734_s8 + $0x1ac] ss:$16 sps:$4 sm:$0xff]  }
 0x103   : > { %1290 = vmatprep.subr.bf16.mxu1 %v1972_v16  ;;  %v2024_v15 = vld [vmem:[%s2734_s8 + $0xc8] ss:$16 sps:$4 sm:$0xff]   ;;  %v2071_v42 = vld [vmem:[%s2734_s8 + $0x3ac] ss:$16 sps:$4 sm:$0xff]  }
 0x104   : > { %v2027_v16 = vld [vmem:[%s2734_s8 + $0x2c8] ss:$16 sps:$4 sm:$0xff]   ;;  %v2074_v45 = vld [vmem:[%s2734_s8 + $0x1cc] ss:$16 sps:$4 sm:$0xff]  }
 0x105   : > { %1250 = vmatpush1.bf16.msra.mxu0 %v1974_v22  ;;  %v2041_v22 = vld [vmem:[%s2734_s8 + $0x30c] ss:$16 sps:$4 sm:$0xff]  }
 0x106   : > { %1291 = vmatpush1.bf16.msra.mxu1 %v1975_v23  ;;  %1251 = vmatprep.subr.bf16.mxu0 %v1976_v27  ;;  %v2036_v23 = vld [vmem:[%s2734_s8 + $0x108] ss:$16 sps:$4 sm:$0xff]   ;;  %v2083_v50 = vld [vmem:[%s2734_s8 + $0x3ec] ss:$16 sps:$4 sm:$0xff]  }
 0x107   : > { %1292 = vmatprep.subr.bf16.mxu1 %v1978_v28  ;;  %v2042_v27 = vld [vmem:[%s2734_s8 + $0x128] ss:$16 sps:$4 sm:$0xff]  }
 0x108   : > { %v2045_v28 = vld [vmem:[%s2734_s8 + $0x328] ss:$16 sps:$4 sm:$0xff]  }
 0x109   : > { %1252 = vmatpush1.bf16.msra.mxu0 %v1980_v33  ;;  %v2056_v33 = vld [vmem:[%s2734_s8 + $0x16c] ss:$16 sps:$4 sm:$0xff]  }
 0x10a   : > { %1293 = vmatpush1.bf16.msra.mxu1 %v1981_v35  ;;  %1253 = vmatprep.subr.bf16.mxu0 %v1982_v39  ;;  %v2054_v35 = vld [vmem:[%s2734_s8 + $0x168] ss:$16 sps:$4 sm:$0xff]  }
 0x10b   : > { %1294 = vmatprep.subr.bf16.mxu1 %v1984_v40  ;;  %v2060_v39 = vld [vmem:[%s2734_s8 + $0x188] ss:$16 sps:$4 sm:$0xff]  }
 0x10c   : > { %v2063_v40 = vld [vmem:[%s2734_s8 + $0x388] ss:$16 sps:$4 sm:$0xff]  }
 0x10d   : > { %1254 = vmatpush1.bf16.msra.mxu0 %v1986_v46  ;;  %v2077_v46 = vld [vmem:[%s2734_s8 + $0x3cc] ss:$16 sps:$4 sm:$0xff]  }
 0x10e   : > { %1295 = vmatpush1.bf16.msra.mxu1 %v1987_v47  ;;  %1305 = vmatprep.subr.bf16.mxu0 %v1990_v51  ;;  %v2072_v47 = vld [vmem:[%s2734_s8 + $0x1c8] ss:$16 sps:$4 sm:$0xff]  }
 0x10f   : > { %1346 = vmatprep.subr.bf16.mxu1 %v1993_v52  ;;  %v2078_v51 = vld [vmem:[%s2734_s8 + $0x1e8] ss:$16 sps:$4 sm:$0xff]  }
 0x110   : > { %1256 = vmatmul.mubr.bf16.vlgmr.msra.gmra.mrb[0].mxu0 %v2818_v53  ;;  %v2081_v52 = vld [vmem:[%s2734_s8 + $0x3e8] ss:$16 sps:$4 sm:$0xff]  }
 0x111   : > { %1297 = vmatmul.mubr.bf16.vlgmr.msra.gmra.mrb[0].mxu1 %v2820_v54  ;;  %1306 = vmatpush1.bf16.msra.mxu0 %v1988_v55 }
 0x112   : > { %1347 = vmatpush1.bf16.msra.mxu1 %v1991_v56  ;;  %1307 = vmatprep.subr.bf16.mxu0 %v1996_v57  ;;  %v451_v56 = vld [vmem:[#allocation2] sm:$0xff] }
 0x113   : > { %1348 = vmatprep.subr.bf16.mxu1 %v1999_v58  ;;  %1337 = vmatprep.mubr.bf16.mxu0 %v448_v48  ;;  %v2075_v48 = vld [vmem:[%s2734_s8 + $0x3c8] ss:$16 sps:$4 sm:$0xff]  }
 0x114   : > { %1378 = vmatprep.mubr.bf16.mxu1 %v450_v49  ;;  %v2080_v49 = vld [vmem:[%s2734_s8 + $0x1ec] ss:$16 sps:$4 sm:$0xff]  }
 0x115   : > { %1308 = vmatpush1.bf16.msra.mxu0 %v1994_v59 }
 0x116   : > { %1349 = vmatpush1.bf16.msra.mxu1 %v1997_v60  ;;  %1309 = vmatprep.subr.bf16.mxu0 %v2002_v61  ;;  %v452_v60 = vld [vmem:[#allocation2 + $0x8] sm:$0xff] }
 0x117   : > { %1350 = vmatprep.subr.bf16.mxu1 %v2005_v62 }
 0x119   : > { %1310 = vmatpush1.bf16.msra.mxu0 %v2000_v63 }
 0x11a   : > { %1351 = vmatpush1.bf16.msra.mxu1 %v2003_v0  ;;  %1311 = vmatprep.subr.bf16.mxu0 %v2008_v1 }
 0x11b   : > { %1352 = vmatprep.subr.bf16.mxu1 %v2011_v2 }
 0x11d   : > { %1312 = vmatpush1.bf16.msra.mxu0 %v2006_v3 }
 0x11e   : > { %1353 = vmatpush1.bf16.msra.mxu1 %v2009_v4  ;;  %1313 = vmatprep.subr.bf16.mxu0 %v2014_v5 }
 0x11f   : > { %1354 = vmatprep.subr.bf16.mxu1 %v2017_v6 }
 0x121   : > { %1314 = vmatpush1.bf16.msra.mxu0 %v2012_v7 }
 0x122   : > { %1355 = vmatpush1.bf16.msra.mxu1 %v2015_v8  ;;  %1315 = vmatprep.subr.bf16.mxu0 %v2020_v9  ;;  %v454_v8 = vld [vmem:[#allocation2 + $0x18] sm:$0xff] }
 0x123   : > { %1356 = vmatprep.subr.bf16.mxu1 %v2023_v10 }
 0x125   : > { %1316 = vmatpush1.bf16.msra.mxu0 %v2018_v11 }
 0x126   : > { %1357 = vmatpush1.bf16.msra.mxu1 %v2021_v12  ;;  %1317 = vmatprep.subr.bf16.mxu0 %v2026_v13 }
 0x127   : > { %1358 = vmatprep.subr.bf16.mxu1 %v2029_v14 }
 0x129   : > { %1318 = vmatpush1.bf16.msra.mxu0 %v2024_v15 }
 0x12a   : > { %1359 = vmatpush1.bf16.msra.mxu1 %v2027_v16  ;;  %1319 = vmatprep.subr.bf16.mxu0 %v2032_v17 }
 0x12b   : > { %1360 = vmatprep.subr.bf16.mxu1 %v2035_v18 }
 0x12d   : > { %1320 = vmatpush1.bf16.msra.mxu0 %v2030_v19 }
 0x12e   : > { %1361 = vmatpush1.bf16.msra.mxu1 %v2033_v20  ;;  %1321 = vmatprep.subr.bf16.mxu0 %v2038_v21 }
 0x12f   : > { %1362 = vmatprep.subr.bf16.mxu1 %v2041_v22 }
 0x131   : > { %1322 = vmatpush1.bf16.msra.mxu0 %v2036_v23 }
 0x132   : > { %1363 = vmatpush1.bf16.msra.mxu1 %v2039_v24  ;;  %1323 = vmatprep.subr.bf16.mxu0 %v2044_v25 }
 0x133   : > { %1364 = vmatprep.subr.bf16.mxu1 %v2047_v26 }
 0x135   : > { %1324 = vmatpush1.bf16.msra.mxu0 %v2042_v27 }
 0x136   : > { %1365 = vmatpush1.bf16.msra.mxu1 %v2045_v28  ;;  %1325 = vmatprep.subr.bf16.mxu0 %v2050_v29 }
 0x137   : > { %1366 = vmatprep.subr.bf16.mxu1 %v2053_v30 }
 0x139   : > { %1326 = vmatpush1.bf16.msra.mxu0 %v2048_v31 }
 0x13a   : > { %1367 = vmatpush1.bf16.msra.mxu1 %v2051_v32  ;;  %1327 = vmatprep.subr.bf16.mxu0 %v2056_v33 }
 0x13b   : > { %1368 = vmatprep.subr.bf16.mxu1 %v2059_v34 }
 0x13d   : > { %1328 = vmatpush1.bf16.msra.mxu0 %v2054_v35 }
 0x13e   : > { %1369 = vmatpush1.bf16.msra.mxu1 %v2057_v36  ;;  %1329 = vmatprep.subr.bf16.mxu0 %v2062_v37 }
 0x13f   : > { %1370 = vmatprep.subr.bf16.mxu1 %v2065_v38 }
 0x141   : > { %1330 = vmatpush1.bf16.msra.mxu0 %v2060_v39 }
 0x142   : > { %1371 = vmatpush1.bf16.msra.mxu1 %v2063_v40  ;;  %1331 = vmatprep.subr.bf16.mxu0 %v2068_v41 }
 0x143   : > { %1372 = vmatprep.subr.bf16.mxu1 %v2071_v42 }
 0x145   : > { %1332 = vmatpush1.bf16.msra.mxu0 %v2066_v43 }
 0x146   : > { %1373 = vmatpush1.bf16.msra.mxu1 %v2069_v44  ;;  %1333 = vmatprep.subr.bf16.mxu0 %v2074_v45 }
 0x147   : > { %1374 = vmatprep.subr.bf16.mxu1 %v2077_v46 }
 0x149   : > { %1334 = vmatpush1.bf16.msra.mxu0 %v2072_v47 }
 0x14a   : > { %1375 = vmatpush1.bf16.msra.mxu1 %v2075_v48  ;;  %1335 = vmatprep.subr.bf16.mxu0 %v2080_v49 }
 0x14b   : > { %1376 = vmatprep.subr.bf16.mxu1 %v2083_v50 }
 0x14d   : > { %1336 = vmatpush1.bf16.msra.mxu0 %v2078_v51 }
 0x14e   : > { %1377 = vmatpush1.bf16.msra.mxu1 %v2081_v52 }
 0x150   : > { %1338 = vmatmul.mubr.bf16.vlgmr.msra.gmra.mrb[4].mxu0 %v2818_v53  ;;  %v453_v53 = vld [vmem:[#allocation2 + $0x10] sm:$0xff] }
 0x151   : > { %1379 = vmatmul.mubr.bf16.vlgmr.msra.gmra.mrb[4].mxu1 %v2820_v54 }
 0x1e3   : > { %v1257_v55 = vpop.f32.mrb[0].mxu0 }
 0x1e4   : > { %v1298_v57 = vpop.f32.mrb[0].mxu1  ;;  %v1259_v59 = vpop.f32.mrb[1].mxu0 }
 0x1e5   : > { %v1299_v58 = vadd.f32 %v1298_v57, %v1257_v55  ;;  %v1300_v61 = vpop.f32.mrb[1].mxu1  ;;  %v1261_v63 = vpop.f32.mrb[2].mxu0 }
 0x1e6   : > { %v1301_v62 = vadd.f32 %v1300_v61, %v1259_v59  ;;  %v1302_v0 = vpop.f32.mrb[2].mxu1  ;;  %v1262_v2 = vpop.f32.mrb[3].mxu0 }
 0x1e7   : > { %v1387_v1 = vadd.f32 %v1299_v58, %v451_v56  ;;  %v1303_v3 = vpop.f32.mrb[3].mxu1 }
 0x1e8   : > { %v1388_v4 = vadd.f32 %v1301_v62, %v452_v60 }
 0x1e9   : > { %1391 = vst [vmem:[#allocation2] sm:$0xff] %v1387_v1 }
 0x1ea   : > { %1392 = vst [vmem:[#allocation2 + $0x8] sm:$0xff] %v1388_v4 }
 0x1f0   : > { %v1399_v17 = vld [vmem:[#allocation2] sm:$0xff] (!%p1736_p10) }
 0x1f1   : > { %v1400_v18 = vld [vmem:[#allocation2 + $0x8] sm:$0xff] (!%p1736_p10)  ;;  %1403 = vst [vmem:[%s2743_s4] sm:$0xff] (!%p1736_p10), %v1399_v17 }
 0x1f2   : > { %1404 = vst [vmem:[%s2743_s4 + $0x8] sm:$0xff] (!%p1736_p10), %v1400_v18 }
 0x223   : > { %v1339_v5 = vpop.f32.mrb[4].mxu0 }
 0x224   : > { %v1380_v6 = vpop.f32.mrb[4].mxu1  ;;  %v1341_v7 = vpop.f32.mrb[5].mxu0  ;;  %1398 = sbr.rel (%p1736_p10) target bundleno = 563 (0x233), region = 60 }
 0x225   : > { %v1381_v54 = vadd.f32 %v1380_v6, %v1339_v5  ;;  %v1382_v9 = vpop.f32.mrb[5].mxu1  ;;  %v1343_v11 = vpop.f32.mrb[6].mxu0 }
 0x226   : > { %v1383_v10 = vadd.f32 %v1382_v9, %v1341_v7  ;;  %v1384_v12 = vpop.f32.mrb[6].mxu1  ;;  %v1344_v14 = vpop.f32.mrb[7].mxu0 }
 0x227   : > { %v1389_v13 = vadd.f32 %v1381_v54, %v453_v53  ;;  %v1385_v15 = vpop.f32.mrb[7].mxu1 }
 0x228   : > { %v1390_v16 = vadd.f32 %v1383_v10, %v454_v8 }
 0x229   : > { %1393 = vst [vmem:[#allocation2 + $0x10] sm:$0xff] %v1389_v13 }
 0x22a   : > { %1394 = vst [vmem:[#allocation2 + $0x18] sm:$0xff] %v1390_v16 }
 0x230   : > { %v1401_v19 = vld [vmem:[#allocation2 + $0x10] sm:$0xff] }
 0x231   : > { %1405 = vst [vmem:[%s2743_s4 + $0x10] sm:$0xff] %v1401_v19  ;;  %v1402_v20 = vld [vmem:[#allocation2 + $0x18] sm:$0xff] }
 0x232   : > { %1406 = vst [vmem:[%s2743_s4 + $0x18] sm:$0xff] %v1402_v20 }
 0x233 PF: > { %s3043_s21 = sld [smem:[#allocation21_spill]]  ;;  %s3045_s29 = sld [smem:[#allocation27_spill]] }
 0x234   : > { %s3046_s23 = sld [smem:[#allocation30_spill]]  ;;  %s1424_s18 = sshll.u32 %s2743_s4, 4  ;;  %s1425_s18 = int_to_ptr.vmem [resolvable:$true] %s1424_s18 }
 0x235   : > { %s1408_s5 = scalar_lea.sflag [#allocation5], %s354_s24  ;;  %s2204_s28 = scalar_lea.vmem %s1425_s18, 512 }
 0x236   : > { %p2205_p9 = scmp.ne.s32.totalorder %s1425_s18, %s2204_s28  ;;  %s2368_s7 = smov [#allocation11]  }
 0x237   : > { %s2208_s8 = sshll.u32 %s2368_s7, 4  ;;  %s2209_s8 = int_to_ptr.vmem [resolvable:$false] %s2208_s8 }
 0x238   : > { %s2210_s30 = scalar_lea.vmem %s2209_s8, 1024  ;;  %p2211_p7 = scmp.lt.s32.totalorder %s1425_s18, %s2209_s8 }
 0x239   : > { %s1746_s19 = sshll.u32 %s3043_s21, 9  ;;  %p3048_p5 = scmp.ne.s32.totalorder %s3045_s29, 0 }
 0x23a   : > { %s3047_s10 = smov %s3046_s23  ;;  %s2897_s16 = scalar_lea.hbm %s3046_s23, %s1746_s19 }
 0x23b   : > { %p2206_p0 = pnand %p2205_p9, %p3048_p5  ;;  %p2212_p11 = scmp.lt.s32.totalorder %s2210_s30, %s2204_s28 }
 0x23d   : > { %p2207_p2 = pneg %p2206_p0  ;;  %p2213_p3 = por %p2212_p11, %p2211_p7 }
 0x23f   : > { %p2214_p12 = pnand %p2213_p3, %p2207_p2 }
 0x241   : > { %2217 = shalt.err (!%p2214_p12)
}
 0x242   : > { %s2218_s24 = scalar_lea.hbm %s2897_s16, 512  ;;  %s2222_s25 = scalar_lea.hbm %s3047_s10, 2048 }
 0x243   : > { %p2219_p4 = scmp.ne.s32.totalorder %s2897_s16, %s2218_s24  ;;  %p2223_p6 = scmp.lt.u32.totalorder %s2897_s16, %s3047_s10 }
 0x244   : > { %p2224_p13 = scmp.lt.u32.totalorder %s2222_s25, %s2218_s24  ;;  %p2226_p9 = scmp.lt.u32.totalorder %s2218_s24, %s2897_s16 }
 0x245   : > { %p2220_p1 = pnand %p2219_p4, %p3048_p5 }
 0x246   : > { %p2225_p10 = por %p2224_p13, %p2223_p6 }
 0x247   : > { %p2221_p8 = pneg %p2220_p1 }
 0x248   : > { %p2227_p0 = por %p2226_p9, %p2225_p10 }
 0x24a   : > { %p2228_p2 = pnand %p2227_p0, %p2221_p8 }
 0x24c   : > { %2231 = shalt.err (!%p2228_p2)
}
 0x24d   : > { %1755 = dma.vmem_to_hbm [thread:$0]  (%p3048_p5), %s1425_s18, 512, %s2897_s16, %s1408_s5  }
 0x24e PF: > { %s3049_s9 = sld [smem:[#allocation22_spill]]  ;;  %s3050_s19 = sld [smem:[#allocation16_spill]] }
 0x24f   : > { %s3051_s15 = sld [smem:[#allocation28_spill]] }
 0x254   : > { %p1775_p7 = scmp.ge.s32.totalorder %s3049_s9, 2  ;;  %s1436_s1 = sand.u32 1, %s3050_s19  }
 0x255   : > { %p3052_p11 = scmp.ne.s32.totalorder %s3051_s15, 0  ;;  %s1437_s23 = scalar_lea.sflag [#allocation5], %s1436_s1 }
 0x257   : > { %p1771_p3 = pnand %p1775_p7, %p3052_p11 }
 0x259   : > { %2301 = dma.done.wait (!%p1771_p3), %s1437_s23, 512  }
 0x25a   : > { %2303 = vsyncadd (!%p1771_p3), %s1437_s23, 4294966784  ;;  %s26_s28 = sadd.s32 1, %s3049_s9   ;;  %s3054_s15 = sld [smem:[#allocation17_spill]] }
 0x25b   : > { %p2924_p12 = scmp.ge.s32.totalorder %s26_s28, 10   ;;  %s3055_s18 = sld [smem:[#allocation18_spill]] }
 0x25c   : > { %s3056_s29 = sld [smem:[#allocation19_spill]]  ;;  %s3057_s23 = sld [smem:[#allocation25_spill]] }
 0x25d   : > { %s3058_s5 = sld [smem:[#allocation24_spill]]  ;;  %s3059_s16 = smov %s2314_s17 }
 0x25e   : > { %s3060_s17 = smov %s2680_s14  ;;  %s3061_s19 = smov %s2326_s20 }
 0x25f   : > { %s3062_s20 = smov %s2685_s12  ;;  %s3063_s21 = smov %s2334_s22 }
 0x260   : > { %s3065_s24 = smov %s2350_s26  ;;  %s3066_s25 = smov %s2354_s27 }
 0x261   : > { %s3068_s27 = smov %s3074_s6  ;;  %25 = sbr.rel (!%p2924_p12) target bundleno = 17 (0x11), region = 126 }
 0x262   : > { %s3064_s22 = smov %s3056_s29 }
 0x263   : > { %s3067_s26 = smov %s3058_s5 }
 0x268   :  { %1442 = vsyncpa [#allocation4], 1 }
 0x269   :  { %1444 = vsyncpa [#allocation4 + $0x1], 1 }
 0x26a   :  { %1445 = vsyncpa [#allocation7], 1 }
 0x26b   :  { %1447 = vsyncpa [#allocation7 + $0x1], 1 }
 0x26c   :  { %1448 = vsyncpa [#allocation10], 1 }
 0x26d   :  { %1450 = vsyncpa [#allocation10 + $0x1], 1 }
 0x26e   :  { %1451 = vsyncpa [#allocation5], 1 }
 0x26f   :  { %1453 = vsyncpa [#allocation5 + $0x1], 1 }

</bundles_post_ra>
